<compile_context>
chip_gen: v7x
topology: tpu7x:2x2x1
jax: 0.10.0
libtpu: 0.0.40
codegen_flags: <defaults>
</compile_context>

<pallas_src>
import functools
import math

import jax
import jax.numpy as jnp
from jax import lax
from jax.experimental import pallas as pl
from jax.experimental.pallas import tpu as pltpu


# ----------------------------------------------------------------------------
# Fused MHA kernel
# ----------------------------------------------------------------------------

def _mha_kernel(*refs, mask_mode):
    if mask_mode == "dense":
        (xq_ref, xk_ref, xv_ref,
         wq_ref, bq_ref, wk_ref, bk_ref, wv_ref, bv_ref,
         wo_ref, bo_ref, bias_ref, o_ref, k_sc, v_sc) = refs
    else:
        (xq_ref, xk_ref, xv_ref,
         wq_ref, bq_ref, wk_ref, bk_ref, wv_ref, bv_ref,
         wo_ref, bo_ref, o_ref, k_sc, v_sc) = refs
        bias_ref = None

    num_heads = wq_ref.shape[0]
    cdt = wq_ref.dtype                      # compute dtype for MXU operands
    TQ, D = xq_ref.shape[1], xq_ref.shape[2]
    Lk = k_sc.shape[1]

    # ---- K/V projections: once per batch element (Lq-tile axis is innermost,
    # "arbitrary", so tq == 0 runs first and the VMEM scratch persists). -------
    @pl.when(pl.program_id(1) == 0)
    def _project_kv():
        xk = xk_ref[0].astype(cdt)          # (Lk, D)
        xv = xv_ref[0].astype(cdt)

        def proj(h, carry):
            k_sc[h] = (jnp.dot(xk, wk_ref[h], preferred_element_type=jnp.float32)
                       + bk_ref[h]).astype(cdt)
            v_sc[h] = (jnp.dot(xv, wv_ref[h], preferred_element_type=jnp.float32)
                       + bv_ref[h]).astype(cdt)
            return carry

        lax.fori_loop(0, num_heads, proj, 0)

    # ---- additive score bias, built once per grid step, shared by all heads --
    if mask_mode == "causal":
        row = lax.broadcasted_iota(jnp.int32, (TQ, Lk), 0) + pl.program_id(1) * TQ
        col = lax.broadcasted_iota(jnp.int32, (TQ, Lk), 1)
        bias = jnp.where(row >= col, jnp.float32(0.0), jnp.float32(-1e30))
    elif mask_mode == "dense":
        bias = bias_ref[...].astype(jnp.float32)
    else:
        bias = None

    xq = xq_ref[0].astype(cdt)              # (TQ, D)

    def head_body(h, acc):
        # Q projection; 1/sqrt(D) is already folded into wq/bq.
        qh = jnp.dot(xq, wq_ref[h], preferred_element_type=jnp.float32) + bq_ref[h]
        # scores: contract head_dim of q with head_dim of k (no explicit k.T)
        s = lax.dot_general(qh.astype(cdt), k_sc[h],
                            dimension_numbers=(((1,), (1,)), ((), ())),
                            preferred_element_type=jnp.float32)      # (TQ, Lk)
        if bias is not None:
            s = s + bias
        # numerically stable softmax; divide goes to the EUP via approx reciprocal
        s = s - jnp.max(s, axis=-1, keepdims=True)
        p = jnp.exp(s)
        p = p * pl.reciprocal(jnp.sum(p, axis=-1, keepdims=True), approx=True)
        # TODO(synk): dropout on p is identity (inference); training-mode dropout
        # would need pltpu.prng_seed / pltpu.prng_random_bits here.
        ctx = jnp.dot(p.astype(cdt), v_sc[h],
                      preferred_element_type=jnp.float32)             # (TQ, hd)
        # accumulate the output projection per head: no concat, bounded live set
        return acc + jnp.dot(ctx.astype(cdt), wo_ref[h],
                             preferred_element_type=jnp.float32)      # (TQ, D)

    acc = lax.fori_loop(0, num_heads, head_body,
                        jnp.zeros((TQ, D), jnp.float32))
    o_ref[0] = (acc + bo_ref[...]).astype(o_ref.dtype)


# ----------------------------------------------------------------------------
# Wrapper
# ----------------------------------------------------------------------------

def _pick_block_q(lq):
    for c in (256, 128, 64, 32, 16, 8):
        if lq % c == 0:
            return c
    return lq


def _const_spec(shape):
    """Constant-index block: single-buffer it (no point double-buffering weights)."""
    idx = lambda b, t, _n=len(shape): (0,) * _n
    try:
        return pl.BlockSpec(shape, idx, pipeline_mode=pl.Buffered(1))
    except TypeError:           # older BlockSpec without pipeline_mode kwarg
        return pl.BlockSpec(shape, idx)


def prepare_mha_params(params, num_heads, compute_dtype=jnp.bfloat16):
    """Convert (in, out)-layout (D, D) weights into the per-head kernel layout.

    Done once, outside the hot path: heads go on a LEADING axis so the kernel
    can index them dynamically, and the 1/sqrt(embed_dim) score scale is folded
    into wq / bq (zero in-kernel scaling work).
    """
    D = params["wq"].shape[0]
    hd = D // num_heads
    scale = 1.0 / math.sqrt(D)   # reference: d_k = query.size(-1) == embed_dim

    def split_w(w):              # (D, H*hd) -> (H, D, hd)
        return jnp.transpose(w.reshape(D, num_heads, hd), (1, 0, 2))

    def split_b(b):              # (H*hd,) -> (H, 1, hd)
        return b.reshape(num_heads, 1, hd)

    return dict(
        wq=(split_w(params["wq"]) * scale).astype(compute_dtype),
        bq=(split_b(params["bq"]) * scale).astype(jnp.float32),
        wk=split_w(params["wk"]).astype(compute_dtype),
        bk=split_b(params["bk"]).astype(jnp.float32),
        wv=split_w(params["wv"]).astype(compute_dtype),
        bv=split_b(params["bv"]).astype(jnp.float32),
        wo=params["wo"].reshape(num_heads, hd, D).astype(compute_dtype),
        bo=params["bo"].reshape(1, D).astype(jnp.float32),
    )


def multihead_attention(prep, query, key, value, mask=None, *,
                        causal=False, block_q=None):
    """Fused MultiheadAttention forward.

    prep:  output of prepare_mha_params
    query: (B, Lq, D); key/value: (B, Lk, D)
    mask:  None, or (Lq, Lk) {0,1} array shared across batch & heads
    causal=True builds the mask in-kernel (no L^2 HBM input).
    """
    B, Lq, D = query.shape
    Lk = key.shape[1]
    assert value.shape == key.shape and key.shape[0] == B and key.shape[2] == D
    H, _, hd = prep["wq"].shape
    assert H * hd == D
    cdt = prep["wq"].dtype

    if causal:
        assert mask is None and Lq == Lk
        mask_mode = "causal"
    elif mask is not None:
        mask_mode = "dense"
    else:
        mask_mode = "none"

    TQ = block_q or _pick_block_q(Lq)
    assert Lq % TQ == 0
    n_tq = Lq // TQ

    kern = functools.partial(_mha_kernel, mask_mode=mask_mode)

    in_specs = [
        pl.BlockSpec((1, TQ, D), lambda b, t: (b, t, 0)),   # query tile
        pl.BlockSpec((1, Lk, D), lambda b, t: (b, 0, 0)),   # key (full, per batch)
        pl.BlockSpec((1, Lk, D), lambda b, t: (b, 0, 0)),   # value (full, per batch)
        _const_spec((H, D, hd)), _const_spec((H, 1, hd)),   # wq, bq (scale folded)
        _const_spec((H, D, hd)), _const_spec((H, 1, hd)),   # wk, bk
        _const_spec((H, D, hd)), _const_spec((H, 1, hd)),   # wv, bv
        _const_spec((H, hd, D)), _const_spec((1, D)),       # wo, bo
    ]
    args = [query, key, value,
            prep["wq"], prep["bq"], prep["wk"], prep["bk"],
            prep["wv"], prep["bv"], prep["wo"], prep["bo"]]

    if mask_mode == "dense":
        # pre-fold masked_fill(mask == 0, -inf) into an additive score bias,
        # stored in the (narrow) compute dtype to halve its DMA/VMEM footprint.
        bias = jnp.where(mask == 0, jnp.float32(-1e30), jnp.float32(0.0)).astype(cdt)
        in_specs.append(pl.BlockSpec((TQ, Lk), lambda b, t: (t, 0)))
        args.append(bias)

    return pl.pallas_call(
        kern,
        out_shape=jax.ShapeDtypeStruct((B, Lq, D), query.dtype),
        grid=(B, n_tq),
        in_specs=in_specs,
        out_specs=pl.BlockSpec((1, TQ, D), lambda b, t: (b, t, 0)),
        scratch_shapes=[pltpu.VMEM((H, Lk, hd), cdt),       # per-batch K (all heads)
                        pltpu.VMEM((H, Lk, hd), cdt)],      # per-batch V (all heads)
        compiler_params=pltpu.CompilerParams(
            # B is the megacore axis; the Lq-tile axis must stay sequential
            # ("arbitrary") so the once-per-batch K/V scratch is reusable.
            dimension_semantics=("parallel", "arbitrary"),
            vmem_limit_bytes=48 * 1024 * 1024),
    )(*args)


# ----------------------------------------------------------------------------
# Pure-jnp reference (same math, per-head Linear layers folded into (D, D))
# ----------------------------------------------------------------------------

def multihead_attention_ref(params, query, key, value, mask=None, *,
                            num_heads, causal=False):
    D = query.shape[-1]
    hd = D // num_heads
    q = query @ params["wq"] + params["bq"]
    k = key @ params["wk"] + params["bk"]
    v = value @ params["wv"] + params["bv"]
    scale = 1.0 / math.sqrt(D)
    Lq, Lk = q.shape[1], k.shape[1]
    if causal:
        mask = jnp.tril(jnp.ones((Lq, Lk), jnp.float32))
    heads = []
    for h in range(num_heads):
        sl = slice(h * hd, (h + 1) * hd)
        s = jnp.einsum("bqd,bkd->bqk", q[..., sl], k[..., sl]) * scale
        if mask is not None:
            s = jnp.where(mask[None] == 0, -1e30, s)   # masked_fill(mask==0, -inf)
        p = jax.nn.softmax(s, axis=-1)                  # dropout is identity
        heads.append(jnp.einsum("bqk,bkd->bqd", p, v[..., sl]))
    out = jnp.concatenate(heads, axis=-1)               # torch.cat over heads
    return out @ params["wo"] + params["bo"]            # out_layer (+ identity dropout)


# ----------------------------------------------------------------------------
# Deterministic params ((in, out) layout vs. nn.Linear's (out, in))
# ----------------------------------------------------------------------------

def init_params(key, d_model, scale=0.08):
    ks = jax.random.split(key, 8)

    def dense(kw, kb):
        w = scale * jax.random.normal(kw, (d_model, d_model), jnp.float32)
        b = scale * jax.random.normal(kb, (d_model,), jnp.float32)
        return w, b

    wq, bq = dense(ks[0], ks[1])
    wk, bk = dense(ks[2], ks[3])
    wv, bv = dense(ks[4], ks[5])
    wo, bo = dense(ks[6], ks[7])
    return dict(wq=wq, bq=bq, wk=wk, bk=bk, wv=wv, bv=bv, wo=wo, bo=bo)


# ----------------------------------------------------------------------------
# Main
# ----------------------------------------------------------------------------

if __name__ == "__main__":
    B, L, D, H = 2, 8, 128, 4      # batch=2, seq=8, embed_dim=128, 4 heads (head_dim=32)

    key0 = jax.random.PRNGKey(0)
    kx, kkv, kp, kp2, kx2 = jax.random.split(key0, 5)
    params = init_params(kp, D)
    x = 0.5 * jax.random.normal(kx, (B, L, D), jnp.float32)

    prep_f32 = prepare_mha_params(params, H, jnp.float32)
    prep_bf16 = prepare_mha_params(params, H, jnp.bfloat16)

    checks = []

    # 1) f32 compute path, no mask — near-exact vs. reference
    out = multihead_attention(prep_f32, x, x, x)
    ref = multihead_attention_ref(params, x, x, x, num_heads=H)
    checks.append(("f32_no_mask", out, ref, 5e-3))

    # 2) bf16 MXU path, no mask
    out = multihead_attention(prep_bf16, x, x, x)
    checks.append(("bf16_no_mask", out, ref, 4e-2))

    # 3) bf16, causal mask generated in-kernel
    out = multihead_attention(prep_bf16, x, x, x, causal=True)
    ref_c = multihead_attention_ref(params, x, x, x, num_heads=H, causal=True)
    checks.append(("bf16_causal", out, ref_c, 4e-2))

    # 4) bf16 cross-attention with an explicit {0,1} padding mask (last 3 keys masked)
    Lk = 16
    mem = 0.5 * jax.random.normal(kkv, (B, Lk, D), jnp.float32)
    pad_mask = jnp.concatenate([jnp.ones((L, Lk - 3), jnp.float32),
                                jnp.zeros((L, 3), jnp.float32)], axis=-1)
    out = multihead_attention(prep_bf16, x, mem, mem, mask=pad_mask)
    ref_x = multihead_attention_ref(params, x, mem, mem, mask=pad_mask, num_heads=H)
    checks.append(("bf16_padded_cross", out, ref_x, 4e-2))

    # 5) small embed_dim generality (embed_dim=32, head_dim=8), f32 path
    D2, H2 = 32, 4
    params2 = init_params(kp2, D2)
    x2 = 0.5 * jax.random.normal(kx2, (B, L, D2), jnp.float32)
    out = multihead_attention(prepare_mha_params(params2, H2, jnp.float32), x2, x2, x2)
    ref2 = multihead_attention_ref(params2, x2, x2, x2, num_heads=H2)
    checks.append(("f32_small_D", out, ref2, 5e-3))

    for name, o, r, tol in checks:
        o = jax.block_until_ready(o)
        assert o.shape == r.shape, (name, o.shape, r.shape)
        denom = float(jnp.maximum(jnp.max(jnp.abs(r)), 1e-6))
        err = float(jnp.max(jnp.abs(o - r))) / denom
        assert err < tol, f"{name}: max rel error {err:.4g} (tol {tol})"

    print("KERNEL_OK")
</pallas_src>

<mosaic_0001>
module attributes {stable_mosaic.version = 11 : i64} {
  func.func @_mha_kernel(%arg0: i32, %arg1: i32, %arg2: memref<1x8x128xf32, #tpu.memory_space<vmem>>, %arg3: memref<1x8x128xf32, #tpu.memory_space<vmem>>, %arg4: memref<1x8x128xf32, #tpu.memory_space<vmem>>, %arg5: memref<4x128x32xf32, #tpu.memory_space<vmem>>, %arg6: memref<4x1x32xf32, #tpu.memory_space<vmem>>, %arg7: memref<4x128x32xf32, #tpu.memory_space<vmem>>, %arg8: memref<4x1x32xf32, #tpu.memory_space<vmem>>, %arg9: memref<4x128x32xf32, #tpu.memory_space<vmem>>, %arg10: memref<4x1x32xf32, #tpu.memory_space<vmem>>, %arg11: memref<4x32x128xf32, #tpu.memory_space<vmem>>, %arg12: memref<1x128xf32, #tpu.memory_space<vmem>>, %arg13: memref<1x8x128xf32, #tpu.memory_space<vmem>>, %arg14: memref<4x8x32xf32, #tpu.memory_space<vmem>>, %arg15: memref<4x8x32xf32, #tpu.memory_space<vmem>>) attributes {dimension_semantics = [#tpu.dimension_semantics<parallel>, #tpu.dimension_semantics<arbitrary>], iteration_bounds = array<i64: 2, 1>, scalar_prefetch = 0 : i64, scratch_operands = 2 : i64, tpu.core_type = #tpu.core_type<tc>, window_params = [{transform_indices = @transform_0, window_bounds = array<i64: 1, 8, 128>}, {transform_indices = @transform_1, window_bounds = array<i64: 1, 8, 128>}, {transform_indices = @transform_2, window_bounds = array<i64: 1, 8, 128>}, {pipeline_mode = #tpu.pipeline_mode<synchronous>, transform_indices = @transform_3, window_bounds = array<i64: 4, 128, 32>}, {pipeline_mode = #tpu.pipeline_mode<synchronous>, transform_indices = @transform_4, window_bounds = array<i64: 4, 1, 32>}, {pipeline_mode = #tpu.pipeline_mode<synchronous>, transform_indices = @transform_5, window_bounds = array<i64: 4, 128, 32>}, {pipeline_mode = #tpu.pipeline_mode<synchronous>, transform_indices = @transform_6, window_bounds = array<i64: 4, 1, 32>}, {pipeline_mode = #tpu.pipeline_mode<synchronous>, transform_indices = @transform_7, window_bounds = array<i64: 4, 128, 32>}, {pipeline_mode = #tpu.pipeline_mode<synchronous>, transform_indices = @transform_8, window_bounds = array<i64: 4, 1, 32>}, {pipeline_mode = #tpu.pipeline_mode<synchronous>, transform_indices = @transform_9, window_bounds = array<i64: 4, 32, 128>}, {pipeline_mode = #tpu.pipeline_mode<synchronous>, transform_indices = @transform_10, window_bounds = array<i64: 1, 128>}, {transform_indices = @transform_11, window_bounds = array<i64: 1, 8, 128>}]} {
    %c0_i32 = arith.constant 0 : i32
    %0 = arith.cmpi eq, %arg1, %c0_i32 : i32
    %1 = arith.extui %0 : i1 to i32
    %c0_i32_0 = arith.constant 0 : i32
    %2 = arith.cmpi ne, %1, %c0_i32_0 : i32
    scf.if %2 {
      %c0_10 = arith.constant 0 : index
      %c0_11 = arith.constant 0 : index
      %c0_12 = arith.constant 0 : index
      %14 = vector.load %arg3[%c0_10, %c0_11, %c0_12] : memref<1x8x128xf32, #tpu.memory_space<vmem>>, vector<1x8x128xf32>
      %15 = vector.shape_cast %14 : vector<1x8x128xf32> to vector<8x128xf32>
      %c0_13 = arith.constant 0 : index
      %c0_14 = arith.constant 0 : index
      %c0_15 = arith.constant 0 : index
      %16 = vector.load %arg4[%c0_13, %c0_14, %c0_15] : memref<1x8x128xf32, #tpu.memory_space<vmem>>, vector<1x8x128xf32>
      %17 = vector.shape_cast %16 : vector<1x8x128xf32> to vector<8x128xf32>
      %c0_i32_16 = arith.constant 0 : i32
      %c4_i32_17 = arith.constant 4 : i32
      %18 = arith.addi %c0_i32_16, %c4_i32_17 : i32
      %c1_i32_18 = arith.constant 1 : i32
      scf.for %arg16 = %c0_i32_16 to %18 step %c1_i32_18  : i32 {
        %19 = arith.index_cast %arg16 : i32 to index
        %c0_20 = arith.constant 0 : index
        %c0_21 = arith.constant 0 : index
        %20 = vector.load %arg7[%19, %c0_20, %c0_21] : memref<4x128x32xf32, #tpu.memory_space<vmem>>, vector<1x128x32xf32>
        %21 = vector.shape_cast %20 : vector<1x128x32xf32> to vector<128x32xf32>
        %cst_22 = arith.constant dense<0.000000e+00> : vector<8x32xf32>
        %22 = tpu.matmul %15, %21, %cst_22 {dimension_numbers = #tpu.dot_dimension_numbers<[1], [0], [0], [1], [0, 0, 1, 1], [], []>} : vector<8x128xf32>, vector<128x32xf32>, vector<8x32xf32> -> vector<8x32xf32>
        %23 = arith.index_cast %arg16 : i32 to index
        %c0_23 = arith.constant 0 : index
        %c0_24 = arith.constant 0 : index
        %24 = vector.load %arg8[%23, %c0_23, %c0_24] : memref<4x1x32xf32, #tpu.memory_space<vmem>>, vector<1x1x32xf32>
        %25 = vector.shape_cast %24 : vector<1x1x32xf32> to vector<1x32xf32>
        %26 = vector.broadcast %25 : vector<1x32xf32> to vector<8x32xf32>
        %27 = arith.addf %22, %26 : vector<8x32xf32>
        %28 = arith.index_cast %arg16 : i32 to index
        %c0_25 = arith.constant 0 : index
        %c0_26 = arith.constant 0 : index
        %29 = vector.load %arg14[%28, %c0_25, %c0_26] : memref<4x8x32xf32, #tpu.memory_space<vmem>>, vector<1x8x32xf32>
        %30 = vector.shape_cast %29 : vector<1x8x32xf32> to vector<8x32xf32>
        %31 = vector.shape_cast %27 : vector<8x32xf32> to vector<1x8x32xf32>
        tpu.vector_store %arg14[%28, %c0_25, %c0_26], %31 {strides = array<i32>} : memref<4x8x32xf32, #tpu.memory_space<vmem>>, vector<1x8x32xf32>,
        %32 = arith.index_cast %arg16 : i32 to index
        %c0_27 = arith.constant 0 : index
        %c0_28 = arith.constant 0 : index
        %33 = vector.load %arg9[%32, %c0_27, %c0_28] : memref<4x128x32xf32, #tpu.memory_space<vmem>>, vector<1x128x32xf32>
        %34 = vector.shape_cast %33 : vector<1x128x32xf32> to vector<128x32xf32>
        %cst_29 = arith.constant dense<0.000000e+00> : vector<8x32xf32>
        %35 = tpu.matmul %17, %34, %cst_29 {dimension_numbers = #tpu.dot_dimension_numbers<[1], [0], [0], [1], [0, 0, 1, 1], [], []>} : vector<8x128xf32>, vector<128x32xf32>, vector<8x32xf32> -> vector<8x32xf32>
        %36 = arith.index_cast %arg16 : i32 to index
        %c0_30 = arith.constant 0 : index
        %c0_31 = arith.constant 0 : index
        %37 = vector.load %arg10[%36, %c0_30, %c0_31] : memref<4x1x32xf32, #tpu.memory_space<vmem>>, vector<1x1x32xf32>
        %38 = vector.shape_cast %37 : vector<1x1x32xf32> to vector<1x32xf32>
        %39 = vector.broadcast %38 : vector<1x32xf32> to vector<8x32xf32>
        %40 = arith.addf %35, %39 : vector<8x32xf32>
        %41 = arith.index_cast %arg16 : i32 to index
        %c0_32 = arith.constant 0 : index
        %c0_33 = arith.constant 0 : index
        %42 = vector.load %arg15[%41, %c0_32, %c0_33] : memref<4x8x32xf32, #tpu.memory_space<vmem>>, vector<1x8x32xf32>
        %43 = vector.shape_cast %42 : vector<1x8x32xf32> to vector<8x32xf32>
        %44 = vector.shape_cast %40 : vector<8x32xf32> to vector<1x8x32xf32>
        tpu.vector_store %arg15[%41, %c0_32, %c0_33], %44 {strides = array<i32>} : memref<4x8x32xf32, #tpu.memory_space<vmem>>, vector<1x8x32xf32>,
      }
      %c4_i32_19 = arith.constant 4 : i32
    } else {
    }
    %c0 = arith.constant 0 : index
    %c0_1 = arith.constant 0 : index
    %c0_2 = arith.constant 0 : index
    %3 = vector.load %arg2[%c0, %c0_1, %c0_2] : memref<1x8x128xf32, #tpu.memory_space<vmem>>, vector<1x8x128xf32>
    %4 = vector.shape_cast %3 : vector<1x8x128xf32> to vector<8x128xf32>
    %cst = arith.constant 0.000000e+00 : f32
    %5 = vector.broadcast %cst : f32 to vector<8x128xf32>
    %c0_i32_3 = arith.constant 0 : i32
    %c4_i32 = arith.constant 4 : i32
    %6 = arith.addi %c0_i32_3, %c4_i32 : i32
    %c1_i32 = arith.constant 1 : i32
    %7 = scf.for %arg16 = %c0_i32_3 to %6 step %c1_i32 iter_args(%arg17 = %5) -> (vector<8x128xf32>)  : i32 {
      %14 = arith.index_cast %arg16 : i32 to index
      %c0_10 = arith.constant 0 : index
      %c0_11 = arith.constant 0 : index
      %15 = vector.load %arg5[%14, %c0_10, %c0_11] : memref<4x128x32xf32, #tpu.memory_space<vmem>>, vector<1x128x32xf32>
      %16 = vector.shape_cast %15 : vector<1x128x32xf32> to vector<128x32xf32>
      %cst_12 = arith.constant dense<0.000000e+00> : vector<8x32xf32>
      %17 = tpu.matmul %4, %16, %cst_12 {dimension_numbers = #tpu.dot_dimension_numbers<[1], [0], [0], [1], [0, 0, 1, 1], [], []>} : vector<8x128xf32>, vector<128x32xf32>, vector<8x32xf32> -> vector<8x32xf32>
      %18 = arith.index_cast %arg16 : i32 to index
      %c0_13 = arith.constant 0 : index
      %c0_14 = arith.constant 0 : index
      %19 = vector.load %arg6[%18, %c0_13, %c0_14] : memref<4x1x32xf32, #tpu.memory_space<vmem>>, vector<1x1x32xf32>
      %20 = vector.shape_cast %19 : vector<1x1x32xf32> to vector<1x32xf32>
      %21 = vector.broadcast %20 : vector<1x32xf32> to vector<8x32xf32>
      %22 = arith.addf %17, %21 : vector<8x32xf32>
      %23 = arith.index_cast %arg16 : i32 to index
      %c0_15 = arith.constant 0 : index
      %c0_16 = arith.constant 0 : index
      %24 = vector.load %arg14[%23, %c0_15, %c0_16] : memref<4x8x32xf32, #tpu.memory_space<vmem>>, vector<1x8x32xf32>
      %25 = vector.shape_cast %24 : vector<1x8x32xf32> to vector<8x32xf32>
      %cst_17 = arith.constant dense<0.000000e+00> : vector<8x8xf32>
      %26 = tpu.matmul %22, %25, %cst_17 {dimension_numbers = #tpu.dot_dimension_numbers<[1], [1], [0], [0], [0, 0, 1, 0], [], []>} : vector<8x32xf32>, vector<8x32xf32>, vector<8x8xf32> -> vector<8x8xf32>
      %cst_18 = arith.constant dense<0xFF800000> : vector<8xf32>
      %27 = vector.multi_reduction <maximumf>, %26, %cst_18 [1] : vector<8x8xf32> to vector<8xf32>
      %28 = vector.shape_cast %27 : vector<8xf32> to vector<8x1xf32>
      %29 = vector.broadcast %28 : vector<8x1xf32> to vector<8x8xf32>
      %30 = arith.subf %26, %29 : vector<8x8xf32>
      %31 = math.exp %30 : vector<8x8xf32>
      %cst_19 = arith.constant dense<0.000000e+00> : vector<8xf32>
      %32 = vector.multi_reduction <add>, %31, %cst_19 [1] : vector<8x8xf32> to vector<8xf32>
      %33 = vector.shape_cast %32 : vector<8xf32> to vector<8x1xf32>
      %34 = tpu.reciprocal %33 {approx = true} : vector<8x1xf32> -> vector<8x1xf32>
      %35 = vector.broadcast %34 : vector<8x1xf32> to vector<8x8xf32>
      %36 = arith.mulf %31, %35 : vector<8x8xf32>
      %37 = arith.index_cast %arg16 : i32 to index
      %c0_20 = arith.constant 0 : index
      %c0_21 = arith.constant 0 : index
      %38 = vector.load %arg15[%37, %c0_20, %c0_21] : memref<4x8x32xf32, #tpu.memory_space<vmem>>, vector<1x8x32xf32>
      %39 = vector.shape_cast %38 : vector<1x8x32xf32> to vector<8x32xf32>
      %cst_22 = arith.constant dense<0.000000e+00> : vector<8x32xf32>
      %40 = tpu.matmul %36, %39, %cst_22 {dimension_numbers = #tpu.dot_dimension_numbers<[1], [0], [0], [1], [0, 0, 1, 1], [], []>} : vector<8x8xf32>, vector<8x32xf32>, vector<8x32xf32> -> vector<8x32xf32>
      %41 = arith.index_cast %arg16 : i32 to index
      %c0_23 = arith.constant 0 : index
      %c0_24 = arith.constant 0 : index
      %42 = vector.load %arg11[%41, %c0_23, %c0_24] : memref<4x32x128xf32, #tpu.memory_space<vmem>>, vector<1x32x128xf32>
      %43 = vector.shape_cast %42 : vector<1x32x128xf32> to vector<32x128xf32>
      %cst_25 = arith.constant dense<0.000000e+00> : vector<8x128xf32>
      %44 = tpu.matmul %40, %43, %cst_25 {dimension_numbers = #tpu.dot_dimension_numbers<[1], [0], [0], [1], [0, 0, 1, 1], [], []>} : vector<8x32xf32>, vector<32x128xf32>, vector<8x128xf32> -> vector<8x128xf32>
      %45 = arith.addf %arg17, %44 : vector<8x128xf32>
      scf.yield %45 : vector<8x128xf32>
    }
    %c4_i32_4 = arith.constant 4 : i32
    %c0_5 = arith.constant 0 : index
    %c0_6 = arith.constant 0 : index
    %8 = vector.load %arg12[%c0_5, %c0_6] : memref<1x128xf32, #tpu.memory_space<vmem>>, vector<1x128xf32>
    %9 = vector.broadcast %8 : vector<1x128xf32> to vector<8x128xf32>
    %10 = arith.addf %7, %9 : vector<8x128xf32>
    %c0_7 = arith.constant 0 : index
    %c0_8 = arith.constant 0 : index
    %c0_9 = arith.constant 0 : index
    %11 = vector.load %arg13[%c0_7, %c0_8, %c0_9] : memref<1x8x128xf32, #tpu.memory_space<vmem>>, vector<1x8x128xf32>
    %12 = vector.shape_cast %11 : vector<1x8x128xf32> to vector<8x128xf32>
    %13 = vector.shape_cast %10 : vector<8x128xf32> to vector<1x8x128xf32>
    tpu.vector_store %arg13[%c0_7, %c0_8, %c0_9], %13 {strides = array<i32>} : memref<1x8x128xf32, #tpu.memory_space<vmem>>, vector<1x8x128xf32>,
    return
  }
  func.func @transform_0(%arg0: i32, %arg1: i32) -> (i32, i32, i32) {
    %c0_i32 = arith.constant 0 : i32
    %c0_i32_0 = arith.constant 0 : i32
    return %arg0, %arg1, %c0_i32 : i32, i32, i32
  }
  func.func @transform_1(%arg0: i32, %arg1: i32) -> (i32, i32, i32) {
    %c0_i32 = arith.constant 0 : i32
    %c0_i32_0 = arith.constant 0 : i32
    %c0_i32_1 = arith.constant 0 : i32
    return %arg0, %c0_i32, %c0_i32_0 : i32, i32, i32
  }
  func.func @transform_2(%arg0: i32, %arg1: i32) -> (i32, i32, i32) {
    %c0_i32 = arith.constant 0 : i32
    %c0_i32_0 = arith.constant 0 : i32
    %c0_i32_1 = arith.constant 0 : i32
    return %arg0, %c0_i32, %c0_i32_0 : i32, i32, i32
  }
  func.func @transform_3(%arg0: i32, %arg1: i32) -> (i32, i32, i32) {
    %c0_i32 = arith.constant 0 : i32
    %c0_i32_0 = arith.constant 0 : i32
    %c0_i32_1 = arith.constant 0 : i32
    %c0_i32_2 = arith.constant 0 : i32
    return %c0_i32, %c0_i32_0, %c0_i32_1 : i32, i32, i32
  }
  func.func @transform_4(%arg0: i32, %arg1: i32) -> (i32, i32, i32) {
    %c0_i32 = arith.constant 0 : i32
    %c0_i32_0 = arith.constant 0 : i32
    %c0_i32_1 = arith.constant 0 : i32
    %c0_i32_2 = arith.constant 0 : i32
    return %c0_i32, %c0_i32_0, %c0_i32_1 : i32, i32, i32
  }
  func.func @transform_5(%arg0: i32, %arg1: i32) -> (i32, i32, i32) {
    %c0_i32 = arith.constant 0 : i32
    %c0_i32_0 = arith.constant 0 : i32
    %c0_i32_1 = arith.constant 0 : i32
    %c0_i32_2 = arith.constant 0 : i32
    return %c0_i32, %c0_i32_0, %c0_i32_1 : i32, i32, i32
  }
  func.func @transform_6(%arg0: i32, %arg1: i32) -> (i32, i32, i32) {
    %c0_i32 = arith.constant 0 : i32
    %c0_i32_0 = arith.constant 0 : i32
    %c0_i32_1 = arith.constant 0 : i32
    %c0_i32_2 = arith.constant 0 : i32
    return %c0_i32, %c0_i32_0, %c0_i32_1 : i32, i32, i32
  }
  func.func @transform_7(%arg0: i32, %arg1: i32) -> (i32, i32, i32) {
    %c0_i32 = arith.constant 0 : i32
    %c0_i32_0 = arith.constant 0 : i32
    %c0_i32_1 = arith.constant 0 : i32
    %c0_i32_2 = arith.constant 0 : i32
    return %c0_i32, %c0_i32_0, %c0_i32_1 : i32, i32, i32
  }
  func.func @transform_8(%arg0: i32, %arg1: i32) -> (i32, i32, i32) {
    %c0_i32 = arith.constant 0 : i32
    %c0_i32_0 = arith.constant 0 : i32
    %c0_i32_1 = arith.constant 0 : i32
    %c0_i32_2 = arith.constant 0 : i32
    return %c0_i32, %c0_i32_0, %c0_i32_1 : i32, i32, i32
  }
  func.func @transform_9(%arg0: i32, %arg1: i32) -> (i32, i32, i32) {
    %c0_i32 = arith.constant 0 : i32
    %c0_i32_0 = arith.constant 0 : i32
    %c0_i32_1 = arith.constant 0 : i32
    %c0_i32_2 = arith.constant 0 : i32
    return %c0_i32, %c0_i32_0, %c0_i32_1 : i32, i32, i32
  }
  func.func @transform_10(%arg0: i32, %arg1: i32) -> (i32, i32) {
    %c0_i32 = arith.constant 0 : i32
    %c0_i32_0 = arith.constant 0 : i32
    %c0_i32_1 = arith.constant 0 : i32
    return %c0_i32, %c0_i32_0 : i32, i32
  }
  func.func @transform_11(%arg0: i32, %arg1: i32) -> (i32, i32, i32) {
    %c0_i32 = arith.constant 0 : i32
    %c0_i32_0 = arith.constant 0 : i32
    return %arg0, %arg1, %c0_i32 : i32, i32, i32
  }
}

</mosaic_0001>

<bundles_post_ra>
// kernel: tpu_custom_call.1
= control target key start
LH: loop header
LB: loop body
LE: loop exit
PB: predicated region body
PF: predicated region fallthrough
CT: control target
= control target key end

     0   :  { %16 = vsyncpa [#allocation5], 0  ;;  %s2004_s0 = inlined_call_operand.vmem [shape: f32[2,8,128], index: 0, kind: input, shape index: {}]   ;;  %s2005_s1 = inlined_call_operand.vmem [shape: f32[2,8,128], index: 1, kind: input, shape index: {}]   ;;  %s2006_s2 = inlined_call_operand.vmem [shape: f32[2,8,128], index: 2, kind: input, shape index: {}]   ;;  %s2007_s3 = inlined_call_operand.vmem [shape: f32[4,128,32], index: 3, kind: input, shape index: {}]   ;;  %s2008_s4 = inlined_call_operand.vmem [shape: f32[4,1,32], index: 4, kind: input, shape index: {}]   ;;  %s2009_s5 = inlined_call_operand.vmem [shape: f32[4,128,32], index: 5, kind: input, shape index: {}]   ;;  %s2010_s6 = inlined_call_operand.vmem [shape: f32[4,1,32], index: 6, kind: input, shape index: {}]   ;;  %s2011_s7 = inlined_call_operand.vmem [shape: f32[4,128,32], index: 7, kind: input, shape index: {}]   ;;  %s2012_s8 = inlined_call_operand.vmem [shape: f32[4,1,32], index: 8, kind: input, shape index: {}]   ;;  %s2013_s9 = inlined_call_operand.vmem [shape: f32[4,32,128], index: 9, kind: input, shape index: {}]   ;;  %s2014_s10 = inlined_call_operand.vmem [shape: f32[1,128], index: 10, kind: input, shape index: {}]   ;;  %s2015_s11 = inlined_call_operand.hbm [shape: f32[2,8,128], index: 11, kind: output, shape index: {}]  }
   0x1   :  { %18 = vsyncpa [#allocation5 + $0x1], 0  ;;  %s1702_s17 = smov 0   ;;  %s1704_s18 = smov 0  }
   0x2   :  { %s1706_s19 = smov 0   ;;  %s1708_s20 = smov 0  }
   0x3   :  { %s1710_s21 = smov 0   ;;  %s1712_s22 = smov 0  }
   0x4 LB: > { %2020 = sst [smem:[#allocation7_spill]] %s1609_s19  ;;  %s1152_s23 = sadd.s32 4294967295, %s1621_s22   ;;  %s1621_s22 = sphi %s1712_s22, %s24_s22   ;;  %s1617_s21 = sphi %s1710_s21, %s2033_s21   ;;  %s1613_s20 = sphi %s1708_s20, %s2036_s20   ;;  %s1609_s19 = sphi %s1706_s19, %s2031_s19   ;;  %s1605_s18 = sphi %s1704_s18, %s2035_s18   ;;  %s1601_s17 = sphi %s1702_s17, %s2034_s17  }
   0x5   : > { %2021 = sst [smem:[#allocation8_spill]] %s1617_s21  ;;  %s1153_s24 = sadd.s32 4294967294, %s1621_s22  }
   0x6   : > { %s36_s25 = sadd.s32 1, %s1617_s21  ;;  %s293_s26 = sadd.s32 1, %s1609_s19 }
   0x7   : > { %p38_p0 = scmp.ge.s32.totalorder %s36_s25, 2  ;;  %p303_p1 = scmp.ne.s32.totalorder %s1609_s19, %s1605_s18 }
   0x8   : > { %p304_p2 = scmp.eq.s32.totalorder %s1152_s23, 1  ;;  %p309_p3 = scmp.ne.s32.totalorder %s1605_s18, %s1601_s17 }
   0x9   : > { %s2038_s25 = smov (%p38_p0, %s36_s25), 0  ;;  %p310_p5 = scmp.eq.s32.totalorder %s1153_s24, 1 }
   0xa   : > { %2022 = sst [smem:[#allocation9_spill]] %s2038_s25  ;;  %p1742_p4 = por %p304_p2, %p303_p1 }
   0xb   : > { %s288_s28 = ssub.s32 %s1617_s21, %s2038_s25  ;;  %p1156_p6 = scmp.ge.s32.totalorder %s1621_s22, 1 }
   0xc   : > { %p291_p7 = scmp.eq.s32.totalorder %s288_s28, 0  ;;  %p1749_p8 = por %p310_p5, %p309_p3 }
   0xd   : > { %p376_p9 = scmp.lt.s32.totalorder %s1621_s22, 3 }
   0xe   : > { %s1755_s30 = scalar_select %p291_p7, %s1609_s19, %s293_s26  }
   0xf   : > { %p377_p10 = pnand %p1156_p6, %p376_p9 }
  0x10   : > { %2025 = sst [smem:[#allocation10_spill]] %s1755_s30  ;;  %s2018_s12 = sand.u32 (!%p377_p10), 1, %s1605_s18  }
  0x11   : > { %380 = sbr.rel (%p377_p10) target bundleno = 1500 (0x5dc), region = 64  ;;  %p426_p11 = scmp.lt.s32.totalorder (!%p377_p10), %s1613_s20, 1 }
  0x12   : > { %s1761_s13 = sshll.u32 (!%p377_p10), %s2018_s12, 3  ;;  %s1783_s19 = smov (!%p377_p10), 0  }
  0x18   : > { %s427_s14 = scalar_select %p426_p11, %s1613_s20, 1 }
  0x1a   : > { %s1764_s15 = sshll.u32 %s427_s14, 3 }
  0x1b   : > { %s432_s24 = scalar_lea.vmem %s2004_s0, %s1764_s15  ;;  %s436_s25 = scalar_lea.vmem %s2005_s1, %s1764_s15 }
  0x1c   : > { %s440_s12 = scalar_lea.vmem %s2006_s2, %s1764_s15  ;;  %v1778_v0 = vld [vmem:[%s436_s25] sm:$0xff] }
  0x1d   : > { %v1780_v1 = vld [vmem:[%s440_s12] sm:$0xff] }
  0x1e LB: >> { %v1635_v2 = vmov 0.0|0.0   ;;  %s1161_s21 = sshll.u32 %s1625_s19, 7  ;;  %vm1636_vm0 = vmmov 0   ;;  %v1637_v3 = vmov 0.0   ;;  %s471_s25 = scalar_lea.vmem %s2010_s6, %s1625_s19  ;;  %vm551_vm1 = vcmask 261120   ;;  %s1625_s19 = sphi %s1783_s19, %s452_s19  }
  0x1f   : >> { %1364 = vmatprep.subr.bf16.mxu0 %v1635_v2  ;;  %1388 = vmatprep.subr.bf16.mxu1 %v1635_v2  ;;  %s1794_s12 = scalar_lea.vmem %s2009_s5, %s1161_s21  ;;  %s1799_s26 = scalar_lea.vmem %s2011_s7, %s1161_s21  ;;  %v1162_v52 = vld [vmem:[%s471_s25] ss:$0 sm:$0xff] }
  0x20   : >> { %1270 = vmatprep.mubr.msk.f32.mxu0 %vm1636_vm0, %v1637_v3  ;;  %1305 = vmatprep.mubr.msk.f32.mxu1 %vm1636_vm0, %v1637_v3  ;;  %v455_v4 = vld [vmem:[%s1794_s12] sm:$0xff]  ;;  %v456_v5 = vld [vmem:[%s1794_s12 + $0x8] sm:$0xff]  ;;  %v457_v9 = vld [vmem:[%s1794_s12 + $0x10] sm:$0xff]  ;;  %s570_s16 = scalar_lea.vmem %s2012_s8, %s1625_s19  ;;  %s1163_s23 = sshll.u32 %s1625_s19, 3 }
  0x21   : >> { %v554_v6 = vld [vmem:[%s1799_s26] sm:$0xff]  ;;  %v1365_v7 = vpack.c.bf16 %v456_v5, %v455_v4  ;;  %v555_v8 = vld [vmem:[%s1799_s26 + $0x8] sm:$0xff]  ;;  %v458_v10 = vld [vmem:[%s1794_s12 + $0x18] sm:$0xff]  ;;  %s648_s14 = scalar_lea.vmem [#allocation3], %s1163_s23  ;;  %s452_s19 = sadd.s32 1, %s1625_s19  }
  0x22   : >> { %v1389_v11 = vpack.c.bf16 %v555_v8, %v554_v6  ;;  %v556_v12 = vld [vmem:[%s1799_s26 + $0x10] sm:$0xff]  ;;  %v557_v13 = vld [vmem:[%s1799_s26 + $0x18] sm:$0xff]  ;;  %v1368_v14 = vpack.c.bf16 %v458_v10, %v457_v9  ;;  %v459_v16 = vld [vmem:[%s1794_s12 + $0x20] sm:$0xff]  ;;  %p449_p12 = scmp.ge.s32.totalorder %s452_s19, 4  }
  0x23   : >> { %1366 = vmatpush3.bf16.msra.mxu0 %v1365_v7  ;;  %v1392_v15 = vpack.c.bf16 %v557_v13, %v556_v12  ;;  %v460_v17 = vld [vmem:[%s1794_s12 + $0x28] sm:$0xff]  ;;  %v558_v18 = vld [vmem:[%s1799_s26 + $0x20] sm:$0xff]  ;;  %v461_v22 = vld [vmem:[%s1794_s12 + $0x30] sm:$0xff]  ;;  %v1870_v61 = vmov (%p449_p12), 0.0   ;;  %s1872_s25 = smov (%p449_p12), 0  }
  0x24   : >> { %1390 = vmatpush3.bf16.msra.mxu1 %v1389_v11  ;;  %1367 = vmatprep.subr.bf16.mxu0 %v1635_v2  ;;  %v559_v19 = vld [vmem:[%s1799_s26 + $0x28] sm:$0xff]  ;;  %v1371_v20 = vpack.c.bf16 %v460_v17, %v459_v16  ;;  %v462_v23 = vld [vmem:[%s1794_s12 + $0x38] sm:$0xff]  ;;  %v560_v24 = vld [vmem:[%s1799_s26 + $0x30] sm:$0xff] }
  0x25   : >> { %1391 = vmatprep.subr.bf16.mxu1 %v1635_v2  ;;  %v1395_v21 = vpack.c.bf16 %v559_v19, %v558_v18  ;;  %v561_v25 = vld [vmem:[%s1799_s26 + $0x38] sm:$0xff]  ;;  %v1374_v26 = vpack.c.bf16 %v462_v23, %v461_v22  ;;  %v463_v28 = vld [vmem:[%s1794_s12 + $0x40] sm:$0xff]  ;;  %v464_v29 = vld [vmem:[%s1794_s12 + $0x48] sm:$0xff] }
  0x26   : >> { %v1398_v27 = vpack.c.bf16 %v561_v25, %v560_v24  ;;  %v562_v30 = vld [vmem:[%s1799_s26 + $0x40] sm:$0xff]  ;;  %v563_v31 = vld [vmem:[%s1799_s26 + $0x48] sm:$0xff]  ;;  %v1377_v32 = vpack.c.bf16 %v464_v29, %v463_v28  ;;  %v465_v34 = vld [vmem:[%s1794_s12 + $0x50] sm:$0xff] }
  0x27   : >> { %1369 = vmatpush3.bf16.msra.mxu0 %v1368_v14  ;;  %v1401_v33 = vpack.c.bf16 %v563_v31, %v562_v30  ;;  %v466_v35 = vld [vmem:[%s1794_s12 + $0x58] sm:$0xff]  ;;  %v564_v36 = vld [vmem:[%s1799_s26 + $0x50] sm:$0xff]  ;;  %v467_v40 = vld [vmem:[%s1794_s12 + $0x60] sm:$0xff] }
  0x28   : >> { %1393 = vmatpush3.bf16.msra.mxu1 %v1392_v15  ;;  %1370 = vmatprep.subr.bf16.mxu0 %v1635_v2  ;;  %v565_v37 = vld [vmem:[%s1799_s26 + $0x58] sm:$0xff]  ;;  %v1380_v38 = vpack.c.bf16 %v466_v35, %v465_v34  ;;  %v468_v41 = vld [vmem:[%s1794_s12 + $0x68] sm:$0xff]  ;;  %v566_v42 = vld [vmem:[%s1799_s26 + $0x60] sm:$0xff] }
  0x29   : >> { %1394 = vmatprep.subr.bf16.mxu1 %v1635_v2  ;;  %v1404_v39 = vpack.c.bf16 %v565_v37, %v564_v36  ;;  %v567_v43 = vld [vmem:[%s1799_s26 + $0x68] sm:$0xff]  ;;  %v1383_v44 = vpack.c.bf16 %v468_v41, %v467_v40  ;;  %v469_v46 = vld [vmem:[%s1794_s12 + $0x70] sm:$0xff]  ;;  %v470_v47 = vld [vmem:[%s1794_s12 + $0x78] sm:$0xff] }
  0x2a   : >> { %v1407_v45 = vpack.c.bf16 %v567_v43, %v566_v42  ;;  %v568_v48 = vld [vmem:[%s1799_s26 + $0x70] sm:$0xff]  ;;  %v569_v49 = vld [vmem:[%s1799_s26 + $0x78] sm:$0xff]  ;;  %v1386_v50 = vpack.c.bf16 %v470_v47, %v469_v46  ;;  %v1164_v53 = vld [vmem:[%s570_s16] ss:$0 sm:$0xff]  ;;  %s550_s26 = scalar_lea.vmem [#allocation2], %s1163_s23 }
  0x2b   : >> { %1372 = vmatpush3.bf16.msra.mxu0 %v1371_v20  ;;  %v1410_v51 = vpack.c.bf16 %v569_v49, %v568_v48  ;;  %v1868_v60 = vld [vmem:[%s432_s24] sm:$0xff] (%p449_p12) }
  0x2c   : >> { %1396 = vmatpush3.bf16.msra.mxu1 %v1395_v21  ;;  %1373 = vmatprep.subr.bf16.mxu0 %v1635_v2 }
  0x2d   : >> { %1397 = vmatprep.subr.bf16.mxu1 %v1635_v2 }
  0x2f   : >> { %1375 = vmatpush3.bf16.msra.mxu0 %v1374_v26 }
  0x30   : >> { %1399 = vmatpush3.bf16.msra.mxu1 %v1398_v27  ;;  %1376 = vmatprep.subr.bf16.mxu0 %v1635_v2 }
  0x31   : >> { %1400 = vmatprep.subr.bf16.mxu1 %v1635_v2 }
  0x33   : >> { %1378 = vmatpush3.bf16.msra.mxu0 %v1377_v32 }
  0x34   : >> { %1402 = vmatpush3.bf16.msra.mxu1 %v1401_v33  ;;  %1379 = vmatprep.subr.bf16.mxu0 %v1635_v2 }
  0x35   : >> { %1403 = vmatprep.subr.bf16.mxu1 %v1635_v2 }
  0x37   : >> { %1381 = vmatpush3.bf16.msra.mxu0 %v1380_v38 }
  0x38   : >> { %1405 = vmatpush3.bf16.msra.mxu1 %v1404_v39  ;;  %1382 = vmatprep.subr.bf16.mxu0 %v1635_v2 }
  0x39   : >> { %1406 = vmatprep.subr.bf16.mxu1 %v1635_v2 }
  0x3b   : >> { %1384 = vmatpush3.bf16.msra.mxu0 %v1383_v44 }
  0x3c   : >> { %1408 = vmatpush3.bf16.msra.mxu1 %v1407_v45  ;;  %1385 = vmatprep.subr.bf16.mxu0 %v1635_v2 }
  0x3d   : >> { %1409 = vmatprep.subr.bf16.mxu1 %v1635_v2 }
  0x3f   : >> { %1387 = vmatpush3.bf16.msra.mxu0 %v1386_v50 }
  0x40   : >> { %1411 = vmatpush3.bf16.msra.mxu1 %v1410_v51 }
  0x42   : >> { %1271 = vmatmul.mubr.f32.vlgmr.msra.gmra.mrb[0].mxu0 %v1778_v0 }
  0x43   : >> { %1306 = vmatmul.mubr.f32.vlgmr.msra.gmra.mrb[0].mxu1 %v1780_v1 }
 0x113   : > { %451 = sbr.rel (!%p449_p12) target bundleno = 30 (0x1e), region = 134 }
 0x115   : >> { %v545_v54 = vpop.f32.mrb[0].mxu0 }
 0x116   : >> { %v546_v55 = vadd.f32 %v1162_v52, %v545_v54  ;;  %v644_v56 = vpop.f32.mrb[0].mxu1  ;;  %v1272_v57 = vpop.f32.mrb[1].mxu0 }
 0x117   : >> { %v645_v58 = vadd.f32 %v1164_v53, %v644_v56  ;;  %v1307_v59 = vpop.f32.mrb[1].mxu1 }
 0x118   : >> { %552 = vst.msk [vmem:[%s550_s26] sm:$0xff] %vm551_vm1, %v546_v55 }
 0x119   : >> { %649 = vst.msk [vmem:[%s648_s14] sm:$0xff] %vm551_vm1, %v645_v58 }
 0x11a LB: >> { %v1638_v62 = vmov 0.0|0.0   ;;  %vm1639_vm2 = vmmov 0   ;;  %v1640_v63 = vmov 0.0   ;;  %s1165_s19 = sshll.u32 %s1633_s25, 7  ;;  %s1167_s30 = sshll.u32 %s1633_s25, 3  ;;  %vm834_vm3 = vcmask 64512   ;;  %s1633_s25 = sphi %s1872_s25, %s656_s25   ;;  %v1629_v61 = vphi %v1870_v61, %v2026_v61  }
 0x11b   : >> { %1412 = vmatprep.subr.bf16.mxu0 %v1638_v62  ;;  %1340 = vmatprep.mubr.msk.f32.mxu0 %vm1639_vm2, %v1640_v63  ;;  %s1890_s14 = scalar_lea.vmem %s2007_s3, %s1165_s19  ;;  %s755_s12 = scalar_lea.vmem [#allocation2], %s1167_s30 }
 0x11c   : >> { %1343 = vmatprep.subr.mxu1 %v1640_v63  ;;  %1345 = vmatprep.mubr.msk.f32.mxu1 %vm1639_vm2, %v1640_v63  ;;  %v660_v0 = vld [vmem:[%s1890_s14] sm:$0xff]  ;;  %v661_v1 = vld [vmem:[%s1890_s14 + $0x8] sm:$0xff]  ;;  %v662_v2 = vld [vmem:[%s1890_s14 + $0x10] sm:$0xff]  ;;  %s676_s26 = scalar_lea.vmem %s2008_s4, %s1633_s25  ;;  %s846_s28 = scalar_lea.vmem [#allocation3], %s1167_s30 }
 0x11d   : >> { %v1413_v3 = vpack.c.bf16 %v661_v1, %v660_v0  ;;  %v663_v4 = vld [vmem:[%s1890_s14 + $0x18] sm:$0xff]  ;;  %v664_v6 = vld [vmem:[%s1890_s14 + $0x20] sm:$0xff]  ;;  %v665_v7 = vld [vmem:[%s1890_s14 + $0x28] sm:$0xff]  ;;  %s1171_s21 = sshll.u32 %s1633_s25, 5  ;;  %s656_s25 = sadd.s32 1, %s1633_s25  }
 0x11e   : >> { %v1416_v5 = vpack.c.bf16 %v663_v4, %v662_v2  ;;  %v1419_v8 = vpack.c.bf16 %v665_v7, %v664_v6  ;;  %v666_v9 = vld [vmem:[%s1890_s14 + $0x30] sm:$0xff]  ;;  %v667_v10 = vld [vmem:[%s1890_s14 + $0x38] sm:$0xff]  ;;  %v668_v12 = vld [vmem:[%s1890_s14 + $0x40] sm:$0xff]  ;;  %s922_s24 = scalar_lea.vmem %s2013_s9, %s1171_s21  ;;  %p653_p13 = scmp.ge.s32.totalorder %s656_s25, 4  }
 0x11f   : >> { %1414 = vmatpush3.bf16.msra.mxu0 %v1413_v3  ;;  %v1422_v11 = vpack.c.bf16 %v667_v10, %v666_v9  ;;  %v669_v13 = vld [vmem:[%s1890_s14 + $0x48] sm:$0xff]  ;;  %v670_v15 = vld [vmem:[%s1890_s14 + $0x50] sm:$0xff]  ;;  %v671_v16 = vld [vmem:[%s1890_s14 + $0x58] sm:$0xff]  ;;  %s2029_s19 = sand.u32 (%p653_p13), 1, %s1605_s18  }
 0x120   : >> { %1415 = vmatprep.subr.bf16.mxu0 %v1638_v62  ;;  %v1425_v14 = vpack.c.bf16 %v669_v13, %v668_v12  ;;  %v1428_v17 = vpack.c.bf16 %v671_v16, %v670_v15  ;;  %v672_v18 = vld [vmem:[%s1890_s14 + $0x60] sm:$0xff]  ;;  %v673_v19 = vld [vmem:[%s1890_s14 + $0x68] sm:$0xff]  ;;  %v674_v21 = vld [vmem:[%s1890_s14 + $0x70] sm:$0xff]  ;;  %s1011_s15 = scalar_lea.sflag (%p653_p13), [#allocation5], %s2029_s19 }
 0x121   : >> { %v1431_v20 = vpack.c.bf16 %v673_v19, %v672_v18  ;;  %v675_v22 = vld [vmem:[%s1890_s14 + $0x78] sm:$0xff]  ;;  %v756_v24 = vld [vmem:[%s755_s12] sm:$0xff]  ;;  %v924_v40 = vld [vmem:[%s922_s24 + $0x8] sm:$0xff]  ;;  %s1175_s12 = sshll.u32 (%p653_p13), %s1613_s20, 7  ;;  %s1641_s20 = smov (%p653_p13), [#allocation4]  }
 0x122   : >> { %v1434_v23 = vpack.c.bf16 %v675_v22, %v674_v21  ;;  %1344 = vmatpush3.xpose.msk.msra.mxu1 %vm551_vm1, %v756_v24  ;;  %v1166_v25 = vld [vmem:[%s676_s26] ss:$0 sm:$0xff]  ;;  %v925_v44 = vld [vmem:[%s922_s24 + $0x10] sm:$0xff]  ;;  %v926_v45 = vld [vmem:[%s922_s24 + $0x18] sm:$0xff]  ;;  %s1951_s26 = scalar_lea.hbm (%p653_p13), %s2015_s11, %s1175_s12  ;;  %s1535_s14 = sshll.u32 (%p653_p13), %s1641_s20, 4  ;;  %s1536_s14 = int_to_ptr.vmem [resolvable:$false] %s1535_s14 }
 0x123   : >> { %1417 = vmatpush3.bf16.msra.mxu0 %v1416_v5  ;;  %1348 = vmatprep.subr.mxu1 %v1640_v63  ;;  %v847_v28 = vld [vmem:[%s846_s28] sm:$0xff]  ;;  %v1440_v46 = vpack.c.bf16 %v926_v45, %v925_v44  ;;  %s2027_s28 = scalar_lea.vmem (%p653_p13), [#allocation4], %s1761_s13  ;;  %s1537_s30 = scalar_lea.vmem (%p653_p13), %s1536_s14, 256 }
 0x124   : >> { %1418 = vmatprep.subr.bf16.mxu0 %v1638_v62  ;;  %v923_v39 = vld [vmem:[%s922_s24] sm:$0xff]  ;;  %s1025_s21 = sshll.u32 (%p653_p13), %s2027_s28, 4  ;;  %s2028_s25 = smov (%p653_p13), %s2027_s28  ;;  %s1955_s21 = int_to_ptr.vmem [resolvable:$true] %s1025_s21 }
 0x125   : >> { %v1437_v42 = vpack.c.bf16 %v924_v40, %v923_v39  ;;  %v1173_v52 = vld [vmem:[%s2014_s10] ss:$0 sm:$0xff] (%p653_p13)  ;;  %s1531_s24 = scalar_lea.vmem (%p653_p13), %s1955_s21, 128  ;;  %p1538_p3 = scmp.lt.s32.totalorder (%p653_p13), %s1955_s21, %s1536_s14 }
 0x126   : > { %p1532_p0 = scmp.ne.s32.totalorder (%p653_p13), %s1955_s21, %s1531_s24  ;;  %p1539_p5 = scmp.lt.s32.totalorder (%p653_p13), %s1537_s30, %s1531_s24 }
 0x127   : >> { %1420 = vmatpush3.bf16.msra.mxu0 %v1419_v8 }
 0x128   : >> { %1421 = vmatprep.subr.bf16.mxu0 %v1638_v62  ;;  %p1533_p1 = pnand (%p653_p13), %p1532_p0, %p1742_p4  ;;  %p1540_p6 = por (%p653_p13), %p1539_p5, %p1538_p3 }
 0x12a   : > { %p1534_p2 = pneg (%p653_p13), %p1533_p1 }
 0x12b   : >> { %1423 = vmatpush3.bf16.msra.mxu0 %v1422_v11 }
 0x12c   : >> { %1424 = vmatprep.subr.bf16.mxu0 %v1638_v62  ;;  %p1541_p7 = pnand (%p653_p13), %p1540_p6, %p1534_p2 }
 0x12f   : >> { %1426 = vmatpush3.bf16.msra.mxu0 %v1425_v14 }
 0x130   : >> { %1427 = vmatprep.subr.bf16.mxu0 %v1638_v62 }
 0x133   : >> { %1429 = vmatpush3.bf16.msra.mxu0 %v1428_v17 }
 0x134   : >> { %1430 = vmatprep.subr.bf16.mxu0 %v1638_v62 }
 0x137   : >> { %1432 = vmatpush3.bf16.msra.mxu0 %v1431_v20 }
 0x138   : >> { %1433 = vmatprep.subr.bf16.mxu0 %v1638_v62 }
 0x13b   : >> { %1435 = vmatpush3.bf16.msra.mxu0 %v1434_v23 }
 0x13e   : >> { %1341 = vmatmul.mubr.f32.vlgmr.msra.gmra.mrb[0].mxu0 %v1868_v60 }
 0x211   : >> { %v750_v26 = vpop.f32.mrb[0].mxu0 }
 0x212   : >> { %v751_v27 = vadd.f32 %v1166_v25, %v750_v26  ;;  %v1342_v29 = vpop.f32.mrb[1].mxu0 }
 0x214   : >> { %1346 = vmatmul.mubr.msk.f32.vlgmr.msra.gmra.mrb[0].mxu1 %vm551_vm1, %v751_v27 }
 0x215   : >> { %1349 = vmatpush3.msra.mxu1 %v847_v28  ;;  %1350 = vmatprep.mubr.msk.f32.mxu1 %vm1639_vm2, %v1640_v63 }
 0x216   : >> { %1436 = vmatprep.subr.bf16.mxu1 %v1638_v62 }
 0x2e7   : >> { %v830_v30 = vpop.f32.mrb[0].mxu1 }
 0x2e8   : >> { %v1347_v31 = vpop.f32.mrb[1].mxu1  ;;  %v835_v32 = vsel %vm834_vm3, %v830_v30, -inf }
 0x2e9   : >> { %836 = vmax.xlane.f32.xlu0 %v835_v32 }
 0x376   : >> { %v837_v33 = vpop.xlane.xlu0 %836 }
 0x377   : >> { %v838_v34 = vsub.f32 %v830_v30, %v837_v33 }
 0x379   : >> { %v839_v35 = vmul.f32 1.442695, %v838_v34 }
 0x37b   : >> { %1527 = vpow2.f32 %v839_v35 }
 0x385   : >> { %v1528_v36 = vpop.eup %1527 }
 0x386   : >> { %v841_v37 = vsel %vm834_vm3, %v1528_v36, 0.0 }
 0x387   : >> { %842 = vadd.xlane.f32.xlu0 %v841_v37 }
 0x414   : >> { %v843_v38 = vpop.xlane.xlu0 %842 }
 0x415   : >> { %1529 = vrcp.f32 %v843_v38 }
 0x41f   : >> { %v1530_v41 = vpop.eup %1529 }
 0x420   : >> { %v845_v43 = vmul.f32 %v1530_v41, %v1528_v36 }
 0x422   : >> { %1351 = vmatmul.mubr.msk.f32.vlgmr.msra.gmra.mrb[2].mxu1 %vm834_vm3, %v845_v43 }
 0x423   : >> { %1438 = vmatpush3.bf16.msra.mxu1 %v1437_v42  ;;  %1361 = vmatprep.mubr.msk.f32.mxu1 %vm1639_vm2, %v1640_v63 }
 0x424   : >> { %1439 = vmatprep.subr.bf16.mxu1 %v1638_v62 }
 0x427   : >> { %1441 = vmatpush3.bf16.msra.mxu1 %v1440_v46 }
 0x4f5   : >> { %v917_v47 = vpop.f32.mrb[2].mxu1 }
 0x4f6   : >> { %v1352_v48 = vpop.f32.mrb[3].mxu1  ;;  %1362 = vmatmul.mubr.msk.f32.vlgmr.msra.gmra.mrb[4].mxu1 %vm551_vm1, %v917_v47 }
 0x5c6   : > { %655 = sbr.rel (!%p653_p13) target bundleno = 282 (0x11a), region = 145 }
 0x5c9   : >> { %v996_v49 = vpop.f32.mrb[4].mxu1 }
 0x5ca   : >> { %v1000_v50 = vadd.f32 %v1629_v61, %v996_v49   ;;  %v1363_v51 = vpop.f32.mrb[5].mxu1 }
 0x5cc   : >> { %v2026_v61 = vmov %v1000_v50  ;;  %v1008_v53 = vadd.f32 (%p653_p13), %v1173_v52, %v1000_v50 }
 0x5ce   : > { %1009 = vst [vmem:[%s2028_s25] sm:$0xff] %v1008_v53 }
 0x5cf   : > { %1544 = shalt.err (!%p1541_p7)
}
 0x5d0   : > { %s1545_s13 = scalar_lea.hbm %s1951_s26, 128  ;;  %s1549_s23 = scalar_lea.hbm %s2015_s11, 256 }
 0x5d1   : > { %p1546_p9 = scmp.ne.s32.totalorder %s1951_s26, %s1545_s13  ;;  %p1550_p12 = scmp.lt.u32.totalorder %s1951_s26, %s2015_s11 }
 0x5d2   : > { %p1551_p13 = scmp.lt.u32.totalorder %s1549_s23, %s1545_s13  ;;  %p1553_p1 = scmp.lt.u32.totalorder %s1545_s13, %s1951_s26 }
 0x5d3   : > { %p1547_p10 = pnand %p1546_p9, %p1742_p4 }
 0x5d4   : > { %p1552_p0 = por %p1551_p13, %p1550_p12 }
 0x5d5   : > { %p1548_p11 = pneg %p1547_p10 }
 0x5d6   : > { %p1554_p2 = por %p1553_p1, %p1552_p0 }
 0x5d8   : > { %p1555_p3 = pnand %p1554_p2, %p1548_p11 }
 0x5da   : > { %1558 = shalt.err (!%p1555_p3)
}
 0x5db   : > { %1442 = dma.vmem_to_hbm [thread:$0]  (%p1742_p4), %s1955_s21, 128, %s1951_s26, %s1011_s15  }
 0x5dc PF: > { %p1448_p5 = scmp.ge.s32.totalorder %s1621_s22, 2  ;;  %s1037_s19 = sand.u32 1, %s1601_s17  }
 0x5dd   : > { %s1038_s24 = scalar_lea.sflag [#allocation5], %s1037_s19 }
 0x5de   : > { %p1445_p6 = pnand %p1448_p5, %p1749_p8 }
 0x5e0   : > { %1596 = dma.done.wait (!%p1445_p6), %s1038_s24, 128  }
 0x5e1   : > { %1598 = vsyncadd (!%p1445_p6), %s1038_s24, 4294967168  ;;  %s24_s22 = sadd.s32 1, %s1621_s22   ;;  %s2030_s20 = sld [smem:[#allocation7_spill]] }
 0x5e2   : > { %p21_p7 = scmp.ge.s32.totalorder %s24_s22, 4   ;;  %s2031_s19 = sld [smem:[#allocation10_spill]] }
 0x5e3   : > { %s2032_s27 = sld [smem:[#allocation8_spill]]  ;;  %s2033_s21 = sld [smem:[#allocation9_spill]] }
 0x5e4   : > { %s2034_s17 = smov %s1605_s18  ;;  %23 = sbr.rel (!%p21_p7) target bundleno = 4 (0x4), region = 156 }
 0x5e7   : > { %s2035_s18 = smov %s2030_s20 }
 0x5e9   : > { %s2036_s20 = smov %s2032_s27 }
 0x5eb   :  { %1043 = vsyncpa [#allocation5], 1 }
 0x5ec   :  { %1045 = vsyncpa [#allocation5 + $0x1], 1 }

</bundles_post_ra>
